<compile_context>
chip_gen: v5e
topology: v5e:2x2
jax: 0.10.0
libtpu: 0.0.40
codegen_flags: <defaults>
</compile_context>

<pallas_src>
import functools

import jax
import jax.numpy as jnp
from jax import lax
from jax.experimental import pallas as pl
from jax.experimental.pallas import tpu as pltpu


def _osc_attn_kernel(sin_ref, cos_ref, q_ref, k_ref, v_ref, o_ref,
                     m_sc, l_sc, acc_sc, qp_sc, *, s_valid, need_kv_mask):
    """One (batch b, query-tile t, key-tile s) grid step of flash attention."""
    s_idx = pl.program_id(2)

    @pl.when(s_idx == 0)
    def _init():
        m_sc[...] = jnp.full(m_sc.shape, -jnp.inf, dtype=m_sc.dtype)
        l_sc[...] = jnp.zeros(l_sc.shape, dtype=l_sc.dtype)
        acc_sc[...] = jnp.zeros(acc_sc.shape, dtype=acc_sc.dtype)
        # Hoisted q-side positional add, done once per T-tile (reused for all
        # num_s steps).  f32 on purpose: v5e's VPU has no bf16 ALUs, and this
        # also matches PyTorch's f32 promotion of `q + sin_weights`.
        qp_sc[...] = q_ref[0].astype(jnp.float32) + sin_ref[...]

    # k-side positional add must stay per-step (the K tile changes each step).
    kp = k_ref[0].astype(jnp.float32) + cos_ref[...]               # (tk, H) f32

    # scores[t, s] = sum_h qp[t, h] * kp[s, h]  -- NT contraction, f32 accum.
    scores = lax.dot_general(
        qp_sc[...], kp, (((1,), (1,)), ((), ())),
        preferred_element_type=jnp.float32)                        # (tq, tk)

    if need_kv_mask:  # static (trace-time) -- only emitted when S was padded
        col = s_idx * scores.shape[1] + lax.broadcasted_iota(
            jnp.int32, scores.shape, 1)
        scores = jnp.where(col < s_valid, scores, -jnp.inf)

    m_prev = m_sc[...]
    m_new = jnp.maximum(m_prev, jnp.max(scores, axis=-1, keepdims=True))
    alpha = jnp.exp(m_prev - m_new)                                # (tq, 1)
    # TODO(synk): evaluate bf16 exp here on v6e/v7x (EUP is the binding slot
    # for this H=16 problem); keep f32 on v5e (no bf16 EUP).
    p = jnp.exp(scores - m_new)                                    # (tq, tk)

    l_sc[...] = alpha * l_sc[...] + jnp.sum(p, axis=-1, keepdims=True)
    # TODO(synk): nn.Dropout on the attention weights is stochastic in
    # training; treated as identity (eval mode).
    acc_sc[...] = alpha * acc_sc[...] + jnp.dot(
        p.astype(v_ref.dtype), v_ref[0], preferred_element_type=jnp.float32)
    m_sc[...] = m_new

    @pl.when(s_idx == pl.num_programs(2) - 1)
    def _finalize():
        # EUP reciprocal (free slot next to the exps) + one Newton step for
        # full f32 accuracy, instead of a VALU divide.
        l = l_sc[...]
        inv_l = pl.reciprocal(l, approx=True)
        inv_l = inv_l * (2.0 - l * inv_l)
        o_ref[0] = (acc_sc[...] * inv_l).astype(o_ref.dtype)


def _round_up(n, m):
    return ((n + m - 1) // m) * m


def _pack_factor(dtype):
    """Sublane pack factor: 8 for 32-bit, 16 for bf16/f16, 32 for 8-bit."""
    return max(8, 32 // jnp.dtype(dtype).itemsize)


def _choose_tile(n, preferred, pack):
    """Return (tile, padded_n).  Tile is a multiple of `pack` (or the full,
    possibly odd, dimension when it fits in one tile); never falls back to an
    unbounded tile, so VMEM usage stays bounded on every generation."""
    if n <= preferred:
        return n, n
    pref = max((preferred // pack) * pack, pack)
    # Prefer an exact divisor (no padding) not smaller than half the target.
    t = pref
    while t >= max(pack, pref // 2):
        if n % t == 0:
            return t, n
        t -= pack
    return pref, _round_up(n, pref)


def oscillatory_attention(query, key, value, *, d_model, mask=None):
    """Pallas implementation of OscillatoryAttention.forward (mask=None path)."""
    # TODO(synk): optional `mask` / `key_padding_mask` path not implemented.
    assert mask is None
    B, T, H = query.shape
    _, S, _ = key.shape
    assert H == d_model // 2, "module semantics require hidden dim == d_model // 2"

    pack_q = _pack_factor(query.dtype)
    pack_k = _pack_factor(key.dtype)

    # Large query tile (fewer K/V HBM re-reads, amortized grid-step overhead);
    # key tile at 512.  Both stay a few MiB of VMEM even at 512x512.
    tq, T_pad = _choose_tile(T, 512, pack_q)
    tk, S_pad = _choose_tile(S, 512, pack_k)
    num_t = T_pad // tq
    num_s = S_pad // tk

    # v7x megacore: only the B and T-tile grid axes are "parallel", so keep
    # B * num_t >= 2 (split T in two when the padding overhead is <= 1/8).
    if B == 1 and num_t == 1:
        half = _round_up(max(T // 2, pack_q), pack_q)
        t_pad2 = _round_up(T, half)
        if half < T and (t_pad2 - T) * 8 <= T:
            tq, T_pad, num_t = half, t_pad2, t_pad2 // half

    if T_pad != T:
        query = jnp.pad(query, ((0, 0), (0, T_pad - T), (0, 0)))
    if S_pad != S:
        key = jnp.pad(key, ((0, 0), (0, S_pad - S), (0, 0)))
        value = jnp.pad(value, ((0, 0), (0, S_pad - S), (0, 0)))

    # Hoisted positional sin/cos constants (computed once, kept in f32).
    pos = jnp.arange(0, d_model, 2, dtype=jnp.float32)
    sin_w = jnp.sin(pos / d_model).reshape(1, H)
    cos_w = jnp.cos(pos / d_model).reshape(1, H)

    kernel = functools.partial(
        _osc_attn_kernel, s_valid=S, need_kv_mask=(S_pad != S))

    out = pl.pallas_call(
        kernel,
        out_shape=jax.ShapeDtypeStruct((B, T_pad, H), query.dtype),
        grid=(B, num_t, num_s),
        in_specs=[
            pl.BlockSpec((1, H), lambda b, t, s: (0, 0)),          # sin (f32)
            pl.BlockSpec((1, H), lambda b, t, s: (0, 0)),          # cos (f32)
            pl.BlockSpec((1, tq, H), lambda b, t, s: (b, t, 0)),   # q tile
            pl.BlockSpec((1, tk, H), lambda b, t, s: (b, s, 0)),   # k tile
            pl.BlockSpec((1, tk, H), lambda b, t, s: (b, s, 0)),   # v tile
        ],
        out_specs=pl.BlockSpec((1, tq, H), lambda b, t, s: (b, t, 0)),
        scratch_shapes=[
            pltpu.VMEM((tq, 1), jnp.float32),   # running max
            pltpu.VMEM((tq, 1), jnp.float32),   # running denominator
            pltpu.VMEM((tq, H), jnp.float32),   # output accumulator
            pltpu.VMEM((tq, H), jnp.float32),   # cached q + sin (f32)
        ],
        compiler_params=pltpu.CompilerParams(
            dimension_semantics=("parallel", "parallel", "arbitrary"),
            vmem_limit_bytes=48 * 1024 * 1024,
        ),
    )(sin_w, cos_w, query, key, value)

    return out[:, :T, :] if T_pad != T else out


def _reference(query, key, value, d_model):
    pos = jnp.arange(0, d_model, 2, dtype=jnp.float32)
    sin_w = jnp.sin(pos / d_model)
    cos_w = jnp.cos(pos / d_model)
    aw = jnp.einsum("bth,bsh->bts", query + sin_w, key + cos_w)
    aw = jax.nn.softmax(aw, axis=-1)
    return jnp.einsum("bts,bsh->bth", aw, value)


if __name__ == "__main__":
    # Small shapes consistent with the module: d_model=32 -> hidden H = 16.
    B, T, S = 2, 8, 8
    D_MODEL = 32
    H = D_MODEL // 2

    key0 = jax.random.PRNGKey(0)
    kq, kk, kv = jax.random.split(key0, 3)
    q = jax.random.normal(kq, (B, T, H), dtype=jnp.float32)
    k = jax.random.normal(kk, (B, S, H), dtype=jnp.float32)
    v = jax.random.normal(kv, (B, S, H), dtype=jnp.float32)

    out = oscillatory_attention(q, k, v, d_model=D_MODEL)
    out = jax.block_until_ready(out)

    ref = _reference(q, k, v, D_MODEL)
    assert out.shape == (B, T, H)
    assert jnp.allclose(out, ref, atol=1e-4, rtol=1e-4), "mismatch vs reference"

    print("KERNEL_OK")
</pallas_src>

<mosaic_0001>
module attributes {stable_mosaic.version = 11 : i64} {
  func.func @_osc_attn_kernel(%arg0: i32, %arg1: i32, %arg2: i32, %arg3: memref<1x16xf32, #tpu.memory_space<vmem>>, %arg4: memref<1x16xf32, #tpu.memory_space<vmem>>, %arg5: memref<1x8x16xf32, #tpu.memory_space<vmem>>, %arg6: memref<1x8x16xf32, #tpu.memory_space<vmem>>, %arg7: memref<1x8x16xf32, #tpu.memory_space<vmem>>, %arg8: memref<1x8x16xf32, #tpu.memory_space<vmem>>, %arg9: memref<8x1xf32, #tpu.memory_space<vmem>>, %arg10: memref<8x1xf32, #tpu.memory_space<vmem>>, %arg11: memref<8x16xf32, #tpu.memory_space<vmem>>, %arg12: memref<8x16xf32, #tpu.memory_space<vmem>>) attributes {dimension_semantics = [#tpu.dimension_semantics<parallel>, #tpu.dimension_semantics<parallel>, #tpu.dimension_semantics<arbitrary>], iteration_bounds = array<i64: 2, 1, 1>, scalar_prefetch = 0 : i64, scratch_operands = 4 : i64, tpu.core_type = #tpu.core_type<tc>, window_params = [{pipeline_mode = #tpu.pipeline_mode<synchronous>, transform_indices = @transform_0, window_bounds = array<i64: 1, 16>}, {pipeline_mode = #tpu.pipeline_mode<synchronous>, transform_indices = @transform_1, window_bounds = array<i64: 1, 16>}, {transform_indices = @transform_2, window_bounds = array<i64: 1, 8, 16>}, {transform_indices = @transform_3, window_bounds = array<i64: 1, 8, 16>}, {transform_indices = @transform_4, window_bounds = array<i64: 1, 8, 16>}, {transform_indices = @transform_5, window_bounds = array<i64: 1, 8, 16>}]} {
    %c0_i32 = arith.constant 0 : i32
    %0 = arith.cmpi eq, %arg2, %c0_i32 : i32
    %1 = arith.extui %0 : i1 to i32
    %c0_i32_0 = arith.constant 0 : i32
    %2 = arith.cmpi ne, %1, %c0_i32_0 : i32
    scf.if %2 {
      %cst_27 = arith.constant 0xFF800000 : f32
      %37 = vector.broadcast %cst_27 : f32 to vector<8x1xf32>
      %c0_28 = arith.constant 0 : index
      %c0_29 = arith.constant 0 : index
      %38 = vector.load %arg9[%c0_28, %c0_29] : memref<8x1xf32, #tpu.memory_space<vmem>>, vector<8x1xf32>
      tpu.vector_store %arg9[%c0_28, %c0_29], %37 {strides = array<i32>} : memref<8x1xf32, #tpu.memory_space<vmem>>, vector<8x1xf32>,
      %cst_30 = arith.constant 0.000000e+00 : f32
      %39 = vector.broadcast %cst_30 : f32 to vector<8x1xf32>
      %c0_31 = arith.constant 0 : index
      %c0_32 = arith.constant 0 : index
      %40 = vector.load %arg10[%c0_31, %c0_32] : memref<8x1xf32, #tpu.memory_space<vmem>>, vector<8x1xf32>
      tpu.vector_store %arg10[%c0_31, %c0_32], %39 {strides = array<i32>} : memref<8x1xf32, #tpu.memory_space<vmem>>, vector<8x1xf32>,
      %cst_33 = arith.constant 0.000000e+00 : f32
      %41 = vector.broadcast %cst_33 : f32 to vector<8x16xf32>
      %c0_34 = arith.constant 0 : index
      %c0_35 = arith.constant 0 : index
      %42 = vector.load %arg11[%c0_34, %c0_35] : memref<8x16xf32, #tpu.memory_space<vmem>>, vector<8x16xf32>
      tpu.vector_store %arg11[%c0_34, %c0_35], %41 {strides = array<i32>} : memref<8x16xf32, #tpu.memory_space<vmem>>, vector<8x16xf32>,
      %c0_36 = arith.constant 0 : index
      %c0_37 = arith.constant 0 : index
      %c0_38 = arith.constant 0 : index
      %43 = vector.load %arg5[%c0_36, %c0_37, %c0_38] : memref<1x8x16xf32, #tpu.memory_space<vmem>>, vector<1x8x16xf32>
      %44 = vector.shape_cast %43 : vector<1x8x16xf32> to vector<8x16xf32>
      %c0_39 = arith.constant 0 : index
      %c0_40 = arith.constant 0 : index
      %45 = vector.load %arg3[%c0_39, %c0_40] : memref<1x16xf32, #tpu.memory_space<vmem>>, vector<1x16xf32>
      %46 = vector.broadcast %45 : vector<1x16xf32> to vector<8x16xf32>
      %47 = arith.addf %44, %46 : vector<8x16xf32>
      %c0_41 = arith.constant 0 : index
      %c0_42 = arith.constant 0 : index
      %48 = vector.load %arg12[%c0_41, %c0_42] : memref<8x16xf32, #tpu.memory_space<vmem>>, vector<8x16xf32>
      tpu.vector_store %arg12[%c0_41, %c0_42], %47 {strides = array<i32>} : memref<8x16xf32, #tpu.memory_space<vmem>>, vector<8x16xf32>,
    } else {
    }
    %c0 = arith.constant 0 : index
    %c0_1 = arith.constant 0 : index
    %c0_2 = arith.constant 0 : index
    %3 = vector.load %arg6[%c0, %c0_1, %c0_2] : memref<1x8x16xf32, #tpu.memory_space<vmem>>, vector<1x8x16xf32>
    %4 = vector.shape_cast %3 : vector<1x8x16xf32> to vector<8x16xf32>
    %c0_3 = arith.constant 0 : index
    %c0_4 = arith.constant 0 : index
    %5 = vector.load %arg4[%c0_3, %c0_4] : memref<1x16xf32, #tpu.memory_space<vmem>>, vector<1x16xf32>
    %6 = vector.broadcast %5 : vector<1x16xf32> to vector<8x16xf32>
    %7 = arith.addf %4, %6 : vector<8x16xf32>
    %c0_5 = arith.constant 0 : index
    %c0_6 = arith.constant 0 : index
    %8 = vector.load %arg12[%c0_5, %c0_6] : memref<8x16xf32, #tpu.memory_space<vmem>>, vector<8x16xf32>
    %cst = arith.constant dense<0.000000e+00> : vector<8x8xf32>
    %9 = tpu.matmul %8, %7, %cst {dimension_numbers = #tpu.dot_dimension_numbers<[1], [1], [0], [0], [0, 0, 1, 0], [], []>} : vector<8x16xf32>, vector<8x16xf32>, vector<8x8xf32> -> vector<8x8xf32>
    %c0_7 = arith.constant 0 : index
    %c0_8 = arith.constant 0 : index
    %10 = vector.load %arg9[%c0_7, %c0_8] : memref<8x1xf32, #tpu.memory_space<vmem>>, vector<8x1xf32>
    %cst_9 = arith.constant dense<0xFF800000> : vector<8xf32>
    %11 = vector.multi_reduction <maximumf>, %9, %cst_9 [1] : vector<8x8xf32> to vector<8xf32>
    %12 = vector.shape_cast %11 : vector<8xf32> to vector<8x1xf32>
    %13 = arith.maximumf %10, %12 : vector<8x1xf32>
    %14 = arith.subf %10, %13 : vector<8x1xf32>
    %15 = math.exp %14 : vector<8x1xf32>
    %16 = vector.broadcast %13 : vector<8x1xf32> to vector<8x8xf32>
    %17 = arith.subf %9, %16 : vector<8x8xf32>
    %18 = math.exp %17 : vector<8x8xf32>
    %c0_10 = arith.constant 0 : index
    %c0_11 = arith.constant 0 : index
    %19 = vector.load %arg10[%c0_10, %c0_11] : memref<8x1xf32, #tpu.memory_space<vmem>>, vector<8x1xf32>
    %20 = arith.mulf %15, %19 : vector<8x1xf32>
    %cst_12 = arith.constant dense<0.000000e+00> : vector<8xf32>
    %21 = vector.multi_reduction <add>, %18, %cst_12 [1] : vector<8x8xf32> to vector<8xf32>
    %22 = vector.shape_cast %21 : vector<8xf32> to vector<8x1xf32>
    %23 = arith.addf %20, %22 : vector<8x1xf32>
    %c0_13 = arith.constant 0 : index
    %c0_14 = arith.constant 0 : index
    %24 = vector.load %arg10[%c0_13, %c0_14] : memref<8x1xf32, #tpu.memory_space<vmem>>, vector<8x1xf32>
    tpu.vector_store %arg10[%c0_13, %c0_14], %23 {strides = array<i32>} : memref<8x1xf32, #tpu.memory_space<vmem>>, vector<8x1xf32>,
    %c0_15 = arith.constant 0 : index
    %c0_16 = arith.constant 0 : index
    %25 = vector.load %arg11[%c0_15, %c0_16] : memref<8x16xf32, #tpu.memory_space<vmem>>, vector<8x16xf32>
    %26 = vector.broadcast %15 : vector<8x1xf32> to vector<8x16xf32>
    %27 = arith.mulf %26, %25 : vector<8x16xf32>
    %c0_17 = arith.constant 0 : index
    %c0_18 = arith.constant 0 : index
    %c0_19 = arith.constant 0 : index
    %28 = vector.load %arg7[%c0_17, %c0_18, %c0_19] : memref<1x8x16xf32, #tpu.memory_space<vmem>>, vector<1x8x16xf32>
    %29 = vector.shape_cast %28 : vector<1x8x16xf32> to vector<8x16xf32>
    %cst_20 = arith.constant dense<0.000000e+00> : vector<8x16xf32>
    %30 = tpu.matmul %18, %29, %cst_20 {dimension_numbers = #tpu.dot_dimension_numbers<[1], [0], [0], [1], [0, 0, 1, 1], [], []>} : vector<8x8xf32>, vector<8x16xf32>, vector<8x16xf32> -> vector<8x16xf32>
    %31 = arith.addf %27, %30 : vector<8x16xf32>
    %c0_21 = arith.constant 0 : index
    %c0_22 = arith.constant 0 : index
    %32 = vector.load %arg11[%c0_21, %c0_22] : memref<8x16xf32, #tpu.memory_space<vmem>>, vector<8x16xf32>
    tpu.vector_store %arg11[%c0_21, %c0_22], %31 {strides = array<i32>} : memref<8x16xf32, #tpu.memory_space<vmem>>, vector<8x16xf32>,
    %c0_23 = arith.constant 0 : index
    %c0_24 = arith.constant 0 : index
    %33 = vector.load %arg9[%c0_23, %c0_24] : memref<8x1xf32, #tpu.memory_space<vmem>>, vector<8x1xf32>
    tpu.vector_store %arg9[%c0_23, %c0_24], %13 {strides = array<i32>} : memref<8x1xf32, #tpu.memory_space<vmem>>, vector<8x1xf32>,
    %c0_i32_25 = arith.constant 0 : i32
    %34 = arith.cmpi eq, %arg2, %c0_i32_25 : i32
    %35 = arith.extui %34 : i1 to i32
    %c0_i32_26 = arith.constant 0 : i32
    %36 = arith.cmpi ne, %35, %c0_i32_26 : i32
    scf.if %36 {
      %c0_27 = arith.constant 0 : index
      %c0_28 = arith.constant 0 : index
      %37 = vector.load %arg10[%c0_27, %c0_28] : memref<8x1xf32, #tpu.memory_space<vmem>>, vector<8x1xf32>
      %38 = tpu.reciprocal %37 {approx = true} : vector<8x1xf32> -> vector<8x1xf32>
      %39 = arith.mulf %37, %38 : vector<8x1xf32>
      %cst_29 = arith.constant 2.000000e+00 : f32
      %40 = vector.broadcast %cst_29 : f32 to vector<8x1xf32>
      %41 = arith.subf %40, %39 : vector<8x1xf32>
      %42 = arith.mulf %38, %41 : vector<8x1xf32>
      %c0_30 = arith.constant 0 : index
      %c0_31 = arith.constant 0 : index
      %43 = vector.load %arg11[%c0_30, %c0_31] : memref<8x16xf32, #tpu.memory_space<vmem>>, vector<8x16xf32>
      %44 = vector.broadcast %42 : vector<8x1xf32> to vector<8x16xf32>
      %45 = arith.mulf %43, %44 : vector<8x16xf32>
      %c0_32 = arith.constant 0 : index
      %c0_33 = arith.constant 0 : index
      %c0_34 = arith.constant 0 : index
      %46 = vector.load %arg8[%c0_32, %c0_33, %c0_34] : memref<1x8x16xf32, #tpu.memory_space<vmem>>, vector<1x8x16xf32>
      %47 = vector.shape_cast %46 : vector<1x8x16xf32> to vector<8x16xf32>
      %48 = vector.shape_cast %45 : vector<8x16xf32> to vector<1x8x16xf32>
      tpu.vector_store %arg8[%c0_32, %c0_33, %c0_34], %48 {strides = array<i32>} : memref<1x8x16xf32, #tpu.memory_space<vmem>>, vector<1x8x16xf32>,
    } else {
    }
    return
  }
  func.func @transform_0(%arg0: i32, %arg1: i32, %arg2: i32) -> (i32, i32) {
    %c0_i32 = arith.constant 0 : i32
    %c0_i32_0 = arith.constant 0 : i32
    %c0_i32_1 = arith.constant 0 : i32
    return %c0_i32, %c0_i32_0 : i32, i32
  }
  func.func @transform_1(%arg0: i32, %arg1: i32, %arg2: i32) -> (i32, i32) {
    %c0_i32 = arith.constant 0 : i32
    %c0_i32_0 = arith.constant 0 : i32
    %c0_i32_1 = arith.constant 0 : i32
    return %c0_i32, %c0_i32_0 : i32, i32
  }
  func.func @transform_2(%arg0: i32, %arg1: i32, %arg2: i32) -> (i32, i32, i32) {
    %c0_i32 = arith.constant 0 : i32
    %c0_i32_0 = arith.constant 0 : i32
    return %arg0, %arg1, %c0_i32 : i32, i32, i32
  }
  func.func @transform_3(%arg0: i32, %arg1: i32, %arg2: i32) -> (i32, i32, i32) {
    %c0_i32 = arith.constant 0 : i32
    %c0_i32_0 = arith.constant 0 : i32
    return %arg0, %arg2, %c0_i32 : i32, i32, i32
  }
  func.func @transform_4(%arg0: i32, %arg1: i32, %arg2: i32) -> (i32, i32, i32) {
    %c0_i32 = arith.constant 0 : i32
    %c0_i32_0 = arith.constant 0 : i32
    return %arg0, %arg2, %c0_i32 : i32, i32, i32
  }
  func.func @transform_5(%arg0: i32, %arg1: i32, %arg2: i32) -> (i32, i32, i32) {
    %c0_i32 = arith.constant 0 : i32
    %c0_i32_0 = arith.constant 0 : i32
    return %arg0, %arg1, %c0_i32 : i32, i32, i32
  }
}

</mosaic_0001>

<bundles_post_ra>
// kernel: tpu_custom_call.1
= control target key start
LH: loop header
LB: loop body
LE: loop exit
PB: predicated region body
PF: predicated region fallthrough
CT: control target
= control target key end

     0   :  { %s1263_s0 = inlined_call_operand.hbm [shape: f32[1,16], index: 0, kind: input, shape index: {}]   ;;  %s1264_s1 = inlined_call_operand.hbm [shape: f32[1,16], index: 1, kind: input, shape index: {}]   ;;  %s1265_s2 = inlined_call_operand.hbm [shape: f32[2,8,16], index: 2, kind: input, shape index: {}]   ;;  %s1266_s3 = inlined_call_operand.hbm [shape: f32[2,8,16], index: 3, kind: input, shape index: {}]   ;;  %s1267_s4 = inlined_call_operand.hbm [shape: f32[2,8,16], index: 4, kind: input, shape index: {}]   ;;  %s1268_s5 = inlined_call_operand.hbm [shape: f32[2,8,16], index: 5, kind: output, shape index: {}]  }
   0x1   :  { %1271 = sst [smem:[#allocation22_spill]] %s1263_s0 }
   0x2   :  { %1272 = sst [smem:[#allocation23_spill]] %s1265_s2 }
   0x3   :  { %1273 = sst [smem:[#allocation24_spill]] %s1266_s3 }
   0x4   :  { %10 = vsyncpa [#allocation7], 0 }
   0x5   :  { %11 = vsyncpa [#allocation10], 0 }
   0x6   :  { %12 = vsyncpa [#allocation8], 0 }
   0x7   :  { %14 = vsyncpa [#allocation8 + $0x1], 0  ;;  %s1067_s18 = smov 0   ;;  %s1069_s19 = smov 0  }
   0x8   :  { %s1071_s20 = smov 0   ;;  %s1073_s21 = smov 0  }
   0x9   :  { %s1075_s22 = smov 0   ;;  %s1077_s23 = smov 0  }
   0xa LB: > { %1274 = sst [smem:[#allocation19_spill]] %s1026_s22  ;;  %s1098_s24 = sadd.s32 4294967295, %s1030_s23   ;;  %s1030_s23 = sphi %s1077_s23, %s20_s23   ;;  %s1026_s22 = sphi %s1075_s22, %s1288_s22   ;;  %s1022_s21 = sphi %s1073_s21, %s1287_s21   ;;  %s1018_s20 = sphi %s1071_s20, %s1291_s20   ;;  %s1014_s19 = sphi %s1069_s19, %s1290_s19   ;;  %s1010_s18 = sphi %s1067_s18, %s1289_s18  }
   0xb   : > { %s658_s25 = sadd.s32 4294967294, %s1030_s23   ;;  %p97_p0 = scmp.ne.s32.totalorder %s1018_s20, %s1014_s19 }
   0xc   : > { %p103_p1 = scmp.ne.s32.totalorder %s1014_s19, %s1010_s18  ;;  %p104_p2 = scmp.eq.s32.totalorder %s1098_s24, 0 }
   0xd   : > { %p185_p3 = scmp.eq.s32.totalorder %s1098_s24, 1  ;;  %p191_p4 = scmp.eq.s32.totalorder %s658_s25, 1 }
   0xe   : > { %p659_p5 = scmp.ge.s32.totalorder %s1030_s23, 1  ;;  %p1110_p6 = por %p104_p2, %p103_p1 }
   0xf   : > { %p1117_p7 = por %p185_p3, %p97_p0  ;;  %p1121_p8 = por %p191_p4, %p103_p1 }
  0x10   : > { %p198_p9 = scmp.lt.s32.totalorder %s1030_s23, 3  ;;  %s1278_s0 = sld [smem:[#allocation22_spill]] }
  0x11   : > { %p662_p11 = scmp.ge.s32.totalorder %s1030_s23, 2  ;;  %s1032_s8 = smov [#allocation6]  }
  0x12   : > { %p1129_p10 = pnand %p659_p5, %p198_p9  ;;  %s212_s9 = sshll.u32 %s1032_s8, 4  ;;  %s213_s9 = int_to_ptr.vmem [resolvable:$true] %s212_s9 }
  0x13   : > { %s39_s11 = sadd.s32 1, %s1026_s22  ;;  %s90_s12 = sadd.s32 1, %s1018_s20 }
  0x14   : > { %p699_p12 = pneg %p1129_p10  ;;  %p41_p1 = scmp.ge.s32.totalorder %s39_s11, 2 }
  0x15   : > { %p98_p3 = scmp.eq.s32.totalorder %s1030_s23, 0  ;;  %p722_p4 = scmp.lt.s32.totalorder %s1030_s23, 2 }
  0x16   : > { %s210_s6 = sshll.u32 %s1278_s0, 4  ;;  %p1138_p13 = pnand %p699_p12, %p104_p2  ;;  %s211_s6 = int_to_ptr.hbm [resolvable:$true] %s210_s6 }
  0x17   : > { %s1293_s11 = smov (%p41_p1, %s39_s11), 0  ;;  %s235_s14 = sand.u32 1, %s1030_s23  }
  0x18   : > { %702 = dma.hbm_to_vmem [thread:$0]  (!%p1138_p13), %s211_s6, 16, %s213_s9, [#allocation7]  }
  0x19   : > { %1281 = sst [smem:[#allocation20_spill]] %s1293_s11  ;;  %s85_s13 = ssub.s32 %s1026_s22, %s1293_s11 }
  0x1a   : > { %p88_p5 = scmp.eq.s32.totalorder %s85_s13, 0  ;;  %p99_p9 = por %p98_p3, %p97_p0 }
  0x1b   : > { %s237_s15 = sand.u32 1, %s1018_s20   ;;  %s664_s25 = sshll.u32 %s1026_s22, 3 }
  0x1c   : > { %s1158_s16 = scalar_select %p88_p5, %s1018_s20, %s90_s12  }
  0x1d   : > { %s663_s17 = sshll.u32 %s237_s15, 3  ;;  %s1283_s2 = sld [smem:[#allocation23_spill]] }
  0x1e   : > { %1282 = sst [smem:[#allocation21_spill]] %s1158_s16  ;;  %s239_s9 = scalar_lea.vmem [#allocation11], %s663_s17 }
  0x1f   : > { %s248_s0 = sshll.u32 %s239_s9, 4  ;;  %p1166_p12 = pnand %p722_p4, %p99_p9  ;;  %s249_s0 = int_to_ptr.vmem [resolvable:$true] %s248_s0 }
  0x20   : > { %s1285_s3 = sld [smem:[#allocation24_spill]]  ;;  %s259_s22 = scalar_lea.vmem [#allocation12], %s663_s17 }
  0x21   : > { %s268_s29 = sshll.u32 %s259_s22, 4  ;;  %s222_s16 = sshll.u32 %s1264_s1, 4  ;;  %s269_s29 = int_to_ptr.vmem [resolvable:$true] %s268_s29  ;;  %s223_s16 = int_to_ptr.hbm [resolvable:$true] %s222_s16 }
  0x22   : > { %s1033_s11 = smov [#allocation9]  }
  0x23   : > { %s244_s6 = scalar_lea.hbm %s1283_s2, %s664_s25  ;;  %s224_s12 = sshll.u32 %s1033_s11, 4  ;;  %s225_s12 = int_to_ptr.vmem [resolvable:$true] %s224_s12 }
  0x24   : > { %s246_s8 = sshll.u32 %s244_s6, 4  ;;  %s236_s6 = scalar_lea.sflag [#allocation7], %s235_s14  ;;  %s247_s8 = int_to_ptr.hbm [resolvable:$true] %s246_s8 }
  0x25   : > { %709 = dma.hbm_to_vmem [thread:$0]  (!%p1166_p12), %s247_s8, 128, %s249_s0, %s236_s6  }
  0x26   : > { %s264_s15 = scalar_lea.hbm %s1285_s3, %s664_s25  ;;  %s284_s14 = scalar_lea.hbm %s1267_s4, %s664_s25 }
  0x27   : > { %s266_s30 = sshll.u32 %s264_s15, 4  ;;  %s279_s0 = scalar_lea.vmem [#allocation13], %s663_s17  ;;  %s267_s30 = int_to_ptr.hbm [resolvable:$true] %s266_s30 }
  0x28   : > { %712 = dma.hbm_to_vmem [thread:$0]  (!%p1166_p12), %s267_s30, 128, %s269_s29, %s236_s6  }
  0x29   : > { %705 = dma.hbm_to_vmem [thread:$0]  (!%p1138_p13), %s223_s16, 16, %s225_s12, [#allocation10]  }
  0x2a   : > { %s288_s8 = sshll.u32 %s279_s0, 4  ;;  %s286_s3 = sshll.u32 %s284_s14, 4  ;;  %s289_s8 = int_to_ptr.vmem [resolvable:$true] %s288_s8  ;;  %s287_s3 = int_to_ptr.hbm [resolvable:$true] %s286_s3 }
  0x2b   : > { %715 = dma.hbm_to_vmem [thread:$0]  (!%p1166_p12), %s287_s3, 128, %s289_s8, %s236_s6  }
  0x2c   : > { %297 = sbr.rel (%p1129_p10) target bundleno = 674 (0x2a2), region = 40 }
  0x31   : > { %993 = dma.done.wait (%p104_p2), [#allocation7], 16  }
  0x32   : > { %995 = vsyncadd (%p104_p2), [#allocation7], 4294967280 }
  0x33   : > { %997 = dma.done.wait (%p104_p2), [#allocation10], 16  }
  0x34   : > { %999 = vsyncadd (%p104_p2), [#allocation10], 4294967280  ;;  %s309_s2 = sand.u32 1, %s1098_s24   ;;  %s311_s3 = sand.u32 1, %s1014_s19  }
  0x35   : > { %s1201_s7 = sshll.u32 %s311_s3, 3  ;;  %s310_s10 = scalar_lea.sflag [#allocation7], %s309_s2 }
  0x36   : > { %s313_s16 = scalar_lea.vmem [#allocation11], %s1201_s7 }
  0x37   : > { %1001 = dma.done.wait (%p1110_p6), %s310_s10, 384  }
  0x38   : > { %1003 = vsyncadd (%p1110_p6), %s310_s10, 4294966912  ;;  %v380_v0 = vld [vmem:[%s313_s16] sm:$0xff]  ;;  %v782_v1 = vld [vmem:[#allocation6] ss:$0 sm:$0xff]  ;;  %vm378_vm0 = vcmask 130048   ;;  %s323_s17 = scalar_lea.vmem [#allocation12], %s1201_s7 }
  0x39   : > { %v387_v2 = vld [vmem:[%s323_s17] sm:$0xff]  ;;  %v385_v4 = vadd.f32 %v782_v1, %v380_v0  ;;  %vm375_vm1 = vcmask 7168   ;;  %v1034_v7 = vmov -inf   ;;  %vm422_vm2 = vcmask 64512   ;;  %s333_s24 = scalar_lea.vmem [#allocation13], %s1201_s7  ;;  %s680_s26 = sshll.u32 %s1022_s21, 3 }
  0x3a   : > { %v783_v3 = vld [vmem:[#allocation9] ss:$0 sm:$0xff]  ;;  %376 = vst.msk [vmem:[#allocation2] sm:$0xff] %vm375_vm1, %v1034_v7  ;;  %v1035_v10 = vmov 0   ;;  %v1036_v11 = vmov 0.0   ;;  %v453_v16 = vld [vmem:[%s333_s24] sm:$0xff]  ;;  %s508_s29 = scalar_lea.hbm %s1268_s5, %s680_s26 }
  0x3b   : > { %v392_v5 = vadd.f32 %v783_v3, %v387_v2  ;;  %386 = vst.msk [vmem:[#allocation5] sm:$0xff] %vm378_vm0, %v385_v4  ;;  %779 = vset.pattern.permute.xlu0 %v1035_v10  ;;  %780 = vset.pattern.permute.xlu1 %v1035_v10  ;;  %s370_s30 = scalar_lea.vmem [#allocation14], %s1201_s7  ;;  %s512_s9 = sshll.u32 %s508_s29, 4  ;;  %s513_s9 = int_to_ptr.hbm [resolvable:$true] %s512_s9 }
  0x3c   : > { %781 = vset.pattern.permute.xlu2 %v1035_v10  ;;  %377 = vst.msk [vmem:[#allocation3] sm:$0xff] %vm375_vm1, %v1036_v11  ;;  %472 = vmatpush.msra.mxu1 %v453_v16  ;;  %s510_s6 = sshll.u32 %s370_s30, 4  ;;  %s497_s11 = scalar_lea.sflag [#allocation8], %s311_s3  ;;  %s511_s6 = int_to_ptr.vmem [resolvable:$true] %s510_s6 }
  0x3d   : > { %676 = vmatpush.xpose.msk.msra.mxu0 %vm378_vm0, %v392_v5  ;;  %379 = vst.msk [vmem:[#allocation4] sm:$0xff] %vm378_vm0, %v1036_v11  ;;  %s954_s12 = sshra.s32 %s513_s9, 4  ;;  %s960_s14 = scalar_lea.hbm %s1268_s5, 16  ;;  %s955_s12 = int_to_ptr.hbm [resolvable:$true] %s954_s12 }
  0x3e   : > { %s956_s21 = scalar_lea.hbm %s955_s12, 8  ;;  %p961_p10 = scmp.lt.s32.totalorder %s955_s12, %s1268_s5 }
  0x3f   : > { %p957_p0 = scmp.ne.s32.totalorder %s955_s12, %s956_s21  ;;  %p962_p13 = scmp.lt.s32.totalorder %s960_s14, %s956_s21 }
  0x41   : > { %v421_v12 = vld [vmem:[#allocation2] sm:$0xff]  ;;  %p958_p2 = pnand %p957_p0, %p1117_p7  ;;  %p963_p1 = por %p962_p13, %p961_p10 }
  0x42   : > { %v393_v6 = vld [vmem:[#allocation5] sm:$0xff] }
  0x43   : > { %677 = vmatmul.msk.f32.vlgmr.msra.gmra.mxu0 %vm378_vm0, %v393_v6  ;;  %v438_v24 = vld [vmem:[#allocation3] sm:$0xff]  ;;  %p959_p6 = pneg %p958_p2 }
  0x44   : > { %v446_v32 = vld [vmem:[#allocation4] sm:$0xff] }
  0x45   : > { %p964_p3 = pnand %p963_p1, %p959_p6 }
  0xc0   : > { %v418_v8 = vpop.f32.mrf.mxu0 }
  0xc1   : > { %v423_v9 = vsel %vm422_vm2, %v418_v8, -inf }
  0xc2   : > { %424 = vmax.xlane.f32.xlu0 %v423_v9 }
 0x135   : > { %v425_v13 = vpop.xlane.xlu0 %424 }
 0x136   : > { %v426_v14 = vmax.f32 %v421_v12, %v425_v13 }
 0x138   : > { %v427_v15 = vsub.f32 %v421_v12, %v426_v14  ;;  %479 = vst.msk [vmem:[#allocation2] sm:$0xff] %vm375_vm1, %v426_v14  ;;  %432 = vperm.xlu0 %779, %v426_v14  }
 0x13a   : > { %v428_v22 = vmul.f32 1.442695, %v427_v15 }
 0x1aa   : > { %v433_v17 = vpop.permute.xlu0 %432 }
 0x1ab   : > { %v435_v18 = vsub.f32 %v418_v8, %v433_v17 }
 0x1ad   : > { %v436_v19 = vmul.f32 1.442695, %v435_v18 }
 0x1af   : > { %784 = vpow2.f32 %v436_v19 }
 0x1b0   : > { %786 = vpow2.f32 %v428_v22 }
 0x1b5   : > { %v785_v20 = vpop.eup %784 }
 0x1b6   : > { %678 = vmatmul.msk.f32.vlgmr.msra.gmra.mxu1 %vm422_vm2, %v785_v20  ;;  %v440_v21 = vsel %vm422_vm2, %v785_v20, 0.0  ;;  %v787_v23 = vpop.eup %786 }
 0x1b7   : > { %441 = vadd.xlane.f32.xlu1 %v440_v21  ;;  %v439_v25 = vmul.f32 %v787_v23, %v438_v24 }
 0x1d0   : > { %449 = vperm.xlu1 %780, %v787_v23  }
 0x22a   : > { %v442_v26 = vpop.xlane.xlu1 %441 }
 0x22b   : > { %v443_v27 = vadd.f32 %v442_v26, %v439_v25 }
 0x22d   : > { %445 = vst.msk [vmem:[#allocation3] sm:$0xff] %vm375_vm1, %v443_v27 }
 0x233   : > { %v474_v36 = vpop.f32.mrf.mxu1 }
 0x234   : > { %v483_v28 = vld [vmem:[#allocation3] sm:$0xff] }
 0x235   : > { %788 = vrcp.f32 %v483_v28 }
 0x23b   : > { %v789_v29 = vpop.eup %788 }
 0x23c   : > { %v485_v30 = vmul.f32 %v789_v29, %v483_v28 }
 0x23e   : > { %v486_v31 = vsub.f32 2.0, %v485_v30 }
 0x240   : > { %v487_v33 = vmul.f32 %v789_v29, %v486_v31 }
 0x242   : > { %v450_v34 = vpop.permute.xlu1 %449  ;;  %491 = vperm.xlu2 %781, %v487_v33  }
 0x243   : > { %v452_v35 = vmul.f32 %v450_v34, %v446_v32 }
 0x245   : > { %v477_v37 = vadd.f32 %v474_v36, %v452_v35 }
 0x247   : > { %478 = vst.msk [vmem:[#allocation4] sm:$0xff] %vm378_vm0, %v477_v37 }
 0x24e   : > { %v488_v38 = vld [vmem:[#allocation4] sm:$0xff] }
 0x29c   : > { %v492_v39 = vpop.permute.xlu2 %491 }
 0x29d   : > { %v494_v40 = vmul.f32 %v492_v39, %v488_v38 }
 0x29f   : > { %495 = vst.msk [vmem:[%s370_s30] sm:$0xff] %vm378_vm0, %v494_v40 }
 0x2a0   : > { %967 = shalt.err (!%p964_p3)
}
 0x2a1   : > { %697 = dma.vmem_to_hbm [thread:$0]  (%p1117_p7), %s511_s6, 128, %s513_s9, %s497_s11  }
 0x2a2 PF: > { %s524_s2 = sand.u32 1, %s1010_s18   ;;  %p717_p4 = pnand %p662_p11, %p1121_p8 }
 0x2a3   : > { %s525_s3 = scalar_lea.sflag [#allocation8], %s524_s2 }
 0x2a4   : > { %p718_p5 = pneg %p717_p4 }
 0x2a6   : > { %1005 = dma.done.wait (%p718_p5), %s525_s3, 128  }
 0x2a7   : > { %1007 = vsyncadd (%p718_p5), %s525_s3, 4294967168  ;;  %s20_s23 = sadd.s32 1, %s1030_s23   ;;  %s1286_s7 = sld [smem:[#allocation21_spill]] }
 0x2a8   : > { %p17_p9 = scmp.ge.s32.totalorder %s20_s23, 4   ;;  %s1287_s21 = sld [smem:[#allocation19_spill]] }
 0x2a9   : > { %s1288_s22 = sld [smem:[#allocation20_spill]]  ;;  %s1289_s18 = smov %s1014_s19 }
 0x2aa   : > { %s1290_s19 = smov %s1018_s20  ;;  %19 = sbr.rel (!%p17_p9) target bundleno = 10 (0xa), region = 122 }
 0x2ad   : > { %s1291_s20 = smov %s1286_s7 }
 0x2af   :  { %531 = vsyncpa [#allocation7], 1 }
 0x2b0   :  { %533 = vsyncpa [#allocation7 + $0x1], 1 }
 0x2b1   :  { %534 = vsyncpa [#allocation10], 1 }
 0x2b2   :  { %535 = vsyncpa [#allocation8], 1 }
 0x2b3   :  { %537 = vsyncpa [#allocation8 + $0x1], 1 }

</bundles_post_ra>
